<compile_context>
chip_gen: v5e
topology: v5e:2x2
jax: 0.10.0
libtpu: 0.0.40
codegen_flags: <defaults>
</compile_context>

<pallas_src>
import functools

import jax
import jax.numpy as jnp
from jax.experimental import pallas as pl
from jax.experimental.pallas import tpu as pltpu


def policy_kernel(x_ref, w1_ref, b1_ref, w2_ref, b2_ref, out_ref, *, n_valid):
    # x_ref:  (TB, D_in_pad)  f32
    # w1_ref: (D_in_pad, H)   f32       (resident)
    # b1_ref: (1, H)          f32       (resident)
    # w2_ref: (H, D_out_pad)  f32       (resident, zero-padded columns)
    # b2_ref: (1, D_out_pad)  f32       (resident, zero-padded columns)
    # out_ref:(TB, D_out_pad) f32       (lane-dense slab; sliced outside)
    x = x_ref[...]
    h = jnp.dot(x, w1_ref[...], preferred_element_type=jnp.float32)   # (TB, H)
    h = jnp.maximum(h + b1_ref[...], 0.0)                             # bias + ReLU

    logits = jnp.dot(h, w2_ref[...],
                     preferred_element_type=jnp.float32) + b2_ref[...]  # (TB, 128)

    # Mask padded output lanes so they do not perturb the softmax.
    lane = jax.lax.broadcasted_iota(jnp.int32, logits.shape, dimension=1)
    logits = jnp.where(lane < n_valid, logits, jnp.float32(-1e30))

    # Numerically-stable softmax over the full (masked) 128-lane extent.
    # Exact f32 division so each valid row sums to 1 within f32 rounding.
    m = jnp.max(logits, axis=-1, keepdims=True)
    e = jnp.exp(logits - m)
    denom = jnp.sum(e, axis=-1, keepdims=True)
    out_ref[...] = (e / denom).astype(out_ref.dtype)


def policy_forward(x, w1, b1, w2, b2, *, block_b=512):
    """x: (B, D_in) f32.  w1: (D_in, H), b1: (1, H), w2: (H, D_out), b2: (1, D_out)."""
    B, d_in = x.shape
    hdim = w1.shape[1]
    d_out = w2.shape[1]

    d_in_p = ((d_in + 15) // 16) * 16          # pad contracting dim (9 -> 16)
    d_out_p = ((d_out + 127) // 128) * 128     # lane-dense output slab (3 -> 128)

    # Batch tile + padded batch so every grid step sees a full block.
    tb = min(block_b, max(8, B))
    b_pad = pl.cdiv(B, tb) * tb

    # One-time layout prep (zero padding).  In a real deployment the padded
    # weight copies would be prepared once outside the hot path.
    x_p = jnp.zeros((b_pad, d_in_p), jnp.float32).at[:B, :d_in].set(
        x.astype(jnp.float32))
    w1_p = jnp.zeros((d_in_p, hdim), jnp.float32).at[:d_in, :].set(
        w1.astype(jnp.float32))
    b1_p = b1.reshape(1, hdim).astype(jnp.float32)
    w2_p = jnp.zeros((hdim, d_out_p), jnp.float32).at[:, :d_out].set(
        w2.astype(jnp.float32))
    b2_p = jnp.zeros((1, d_out_p), jnp.float32).at[:, :d_out].set(
        b2.reshape(1, d_out).astype(jnp.float32))

    out_pad = pl.pallas_call(
        functools.partial(policy_kernel, n_valid=d_out),
        out_shape=jax.ShapeDtypeStruct((b_pad, d_out_p), jnp.float32),
        grid=(b_pad // tb,),
        in_specs=[
            pl.BlockSpec((tb, d_in_p), lambda i: (i, 0)),      # x tile (pipelined)
            pl.BlockSpec((d_in_p, hdim), lambda i: (0, 0)),    # w1 (resident)
            pl.BlockSpec((1, hdim), lambda i: (0, 0)),         # b1 (resident)
            pl.BlockSpec((hdim, d_out_p), lambda i: (0, 0)),   # w2 (resident)
            pl.BlockSpec((1, d_out_p), lambda i: (0, 0)),      # b2 (resident)
        ],
        out_specs=pl.BlockSpec((tb, d_out_p), lambda i: (i, 0)),
        compiler_params=pltpu.CompilerParams(
            dimension_semantics=("parallel",),       # megacore-shard batch
            vmem_limit_bytes=32 * 1024 * 1024,
        ),
    )(x_p, w1_p, b1_p, w2_p, b2_p)

    return out_pad[:B, :d_out]


def init_params(key, input_dim=9, hidden_dim=128, output_dim=3):
    # Mimic PyTorch nn.Linear default init: uniform(-1/sqrt(fan_in), +1/sqrt(fan_in)).
    k1, k2, k3, k4 = jax.random.split(key, 4)
    bound1 = 1.0 / jnp.sqrt(jnp.float32(input_dim))
    bound2 = 1.0 / jnp.sqrt(jnp.float32(hidden_dim))
    # stored as (in, out) so the kernel does x @ W
    w1 = jax.random.uniform(k1, (input_dim, hidden_dim), jnp.float32, -bound1, bound1)
    b1 = jax.random.uniform(k2, (1, hidden_dim), jnp.float32, -bound1, bound1)
    w2 = jax.random.uniform(k3, (hidden_dim, output_dim), jnp.float32, -bound2, bound2)
    b2 = jax.random.uniform(k4, (1, output_dim), jnp.float32, -bound2, bound2)
    return w1, b1, w2, b2


def reference_forward(x, w1, b1, w2, b2):
    # Pure-JAX f32 reference matching the PyTorch module's forward pass.
    h = jnp.maximum(jnp.dot(x, w1) + b1, 0.0)
    logits = jnp.dot(h, w2) + b2
    return jax.nn.softmax(logits, axis=-1)


if __name__ == "__main__":
    key = jax.random.PRNGKey(0)
    kx, kp = jax.random.split(key)

    B, D_IN, H, D_OUT = 8, 9, 128, 3
    x = jax.random.normal(kx, (B, D_IN), dtype=jnp.float32)
    w1, b1, w2, b2 = init_params(kp, D_IN, H, D_OUT)

    out = policy_forward(x, w1, b1, w2, b2)
    out = jax.block_until_ready(out)

    ref = reference_forward(x, w1, b1, w2, b2)
    assert out.shape == (B, D_OUT)
    assert jnp.allclose(out, ref, atol=1e-4, rtol=1e-4)
    assert jnp.allclose(jnp.sum(out, axis=-1), 1.0, atol=1e-4)

    print("KERNEL_OK")
</pallas_src>

<mosaic_0001>
module attributes {stable_mosaic.version = 11 : i64} {
  func.func @policy_kernel(%arg0: i32, %arg1: memref<8x16xf32, #tpu.memory_space<vmem>>, %arg2: memref<16x128xf32, #tpu.memory_space<vmem>>, %arg3: memref<1x128xf32, #tpu.memory_space<vmem>>, %arg4: memref<128x128xf32, #tpu.memory_space<vmem>>, %arg5: memref<1x128xf32, #tpu.memory_space<vmem>>, %arg6: memref<8x128xf32, #tpu.memory_space<vmem>>) attributes {dimension_semantics = [#tpu.dimension_semantics<parallel>], iteration_bounds = array<i64: 1>, scalar_prefetch = 0 : i64, scratch_operands = 0 : i64, tpu.core_type = #tpu.core_type<tc>, window_params = [{transform_indices = @transform_0, window_bounds = array<i64: 8, 16>}, {pipeline_mode = #tpu.pipeline_mode<synchronous>, transform_indices = @transform_1, window_bounds = array<i64: 16, 128>}, {pipeline_mode = #tpu.pipeline_mode<synchronous>, transform_indices = @transform_2, window_bounds = array<i64: 1, 128>}, {pipeline_mode = #tpu.pipeline_mode<synchronous>, transform_indices = @transform_3, window_bounds = array<i64: 128, 128>}, {pipeline_mode = #tpu.pipeline_mode<synchronous>, transform_indices = @transform_4, window_bounds = array<i64: 1, 128>}, {transform_indices = @transform_5, window_bounds = array<i64: 8, 128>}]} {
    %c0 = arith.constant 0 : index
    %c0_0 = arith.constant 0 : index
    %0 = vector.load %arg1[%c0, %c0_0] : memref<8x16xf32, #tpu.memory_space<vmem>>, vector<8x16xf32>
    %c0_1 = arith.constant 0 : index
    %c0_2 = arith.constant 0 : index
    %1 = vector.load %arg2[%c0_1, %c0_2] : memref<16x128xf32, #tpu.memory_space<vmem>>, vector<16x128xf32>
    %cst = arith.constant dense<0.000000e+00> : vector<8x128xf32>
    %2 = tpu.matmul %0, %1, %cst {dimension_numbers = #tpu.dot_dimension_numbers<[1], [0], [0], [1], [0, 0, 1, 1], [], []>} : vector<8x16xf32>, vector<16x128xf32>, vector<8x128xf32> -> vector<8x128xf32>
    %c0_3 = arith.constant 0 : index
    %c0_4 = arith.constant 0 : index
    %3 = vector.load %arg3[%c0_3, %c0_4] : memref<1x128xf32, #tpu.memory_space<vmem>>, vector<1x128xf32>
    %4 = vector.broadcast %3 : vector<1x128xf32> to vector<8x128xf32>
    %5 = arith.addf %2, %4 : vector<8x128xf32>
    %cst_5 = arith.constant 0.000000e+00 : f32
    %6 = vector.broadcast %cst_5 : f32 to vector<8x128xf32>
    %7 = arith.maximumf %5, %6 : vector<8x128xf32>
    %c0_6 = arith.constant 0 : index
    %c0_7 = arith.constant 0 : index
    %8 = vector.load %arg4[%c0_6, %c0_7] : memref<128x128xf32, #tpu.memory_space<vmem>>, vector<128x128xf32>
    %cst_8 = arith.constant dense<0.000000e+00> : vector<8x128xf32>
    %9 = tpu.matmul %7, %8, %cst_8 {dimension_numbers = #tpu.dot_dimension_numbers<[1], [0], [0], [1], [0, 0, 1, 1], [], []>} : vector<8x128xf32>, vector<128x128xf32>, vector<8x128xf32> -> vector<8x128xf32>
    %c0_9 = arith.constant 0 : index
    %c0_10 = arith.constant 0 : index
    %10 = vector.load %arg5[%c0_9, %c0_10] : memref<1x128xf32, #tpu.memory_space<vmem>>, vector<1x128xf32>
    %11 = vector.broadcast %10 : vector<1x128xf32> to vector<8x128xf32>
    %12 = arith.addf %9, %11 : vector<8x128xf32>
    %13 = tpu.iota {dimensions = array<i32: 1>} : vector<8x128xi32>
    %c3_i32 = arith.constant 3 : i32
    %14 = vector.broadcast %c3_i32 : i32 to vector<8x128xi32>
    %15 = arith.cmpi slt, %13, %14 : vector<8x128xi32>
    %cst_11 = arith.constant -1.000000e+30 : f32
    %16 = vector.broadcast %cst_11 : f32 to vector<8x128xf32>
    %17 = arith.select %15, %12, %16 : vector<8x128xi1>, vector<8x128xf32>
    %cst_12 = arith.constant dense<0xFF800000> : vector<8xf32>
    %18 = vector.multi_reduction <maximumf>, %17, %cst_12 [1] : vector<8x128xf32> to vector<8xf32>
    %19 = vector.shape_cast %18 : vector<8xf32> to vector<8x1xf32>
    %20 = vector.broadcast %19 : vector<8x1xf32> to vector<8x128xf32>
    %21 = arith.subf %17, %20 : vector<8x128xf32>
    %22 = math.exp %21 : vector<8x128xf32>
    %cst_13 = arith.constant dense<0.000000e+00> : vector<8xf32>
    %23 = vector.multi_reduction <add>, %22, %cst_13 [1] : vector<8x128xf32> to vector<8xf32>
    %24 = vector.shape_cast %23 : vector<8xf32> to vector<8x1xf32>
    %25 = vector.broadcast %24 : vector<8x1xf32> to vector<8x128xf32>
    %26 = arith.divf %22, %25 : vector<8x128xf32>
    %c0_14 = arith.constant 0 : index
    %c0_15 = arith.constant 0 : index
    %27 = vector.load %arg6[%c0_14, %c0_15] : memref<8x128xf32, #tpu.memory_space<vmem>>, vector<8x128xf32>
    tpu.vector_store %arg6[%c0_14, %c0_15], %26 {strides = array<i32>} : memref<8x128xf32, #tpu.memory_space<vmem>>, vector<8x128xf32>,
    return
  }
  func.func @transform_0(%arg0: i32) -> (i32, i32) {
    %c0_i32 = arith.constant 0 : i32
    %c0_i32_0 = arith.constant 0 : i32
    return %arg0, %c0_i32 : i32, i32
  }
  func.func @transform_1(%arg0: i32) -> (i32, i32) {
    %c0_i32 = arith.constant 0 : i32
    %c0_i32_0 = arith.constant 0 : i32
    %c0_i32_1 = arith.constant 0 : i32
    return %c0_i32, %c0_i32_0 : i32, i32
  }
  func.func @transform_2(%arg0: i32) -> (i32, i32) {
    %c0_i32 = arith.constant 0 : i32
    %c0_i32_0 = arith.constant 0 : i32
    %c0_i32_1 = arith.constant 0 : i32
    return %c0_i32, %c0_i32_0 : i32, i32
  }
  func.func @transform_3(%arg0: i32) -> (i32, i32) {
    %c0_i32 = arith.constant 0 : i32
    %c0_i32_0 = arith.constant 0 : i32
    %c0_i32_1 = arith.constant 0 : i32
    return %c0_i32, %c0_i32_0 : i32, i32
  }
  func.func @transform_4(%arg0: i32) -> (i32, i32) {
    %c0_i32 = arith.constant 0 : i32
    %c0_i32_0 = arith.constant 0 : i32
    %c0_i32_1 = arith.constant 0 : i32
    return %c0_i32, %c0_i32_0 : i32, i32
  }
  func.func @transform_5(%arg0: i32) -> (i32, i32) {
    %c0_i32 = arith.constant 0 : i32
    %c0_i32_0 = arith.constant 0 : i32
    return %arg0, %c0_i32 : i32, i32
  }
}

</mosaic_0001>

<bundles_post_ra>
// kernel: tpu_custom_call.1
= control target key start
LH: loop header
LB: loop body
LE: loop exit
PB: predicated region body
PF: predicated region fallthrough
CT: control target
= control target key end

     0   :  { %10 = vsyncpa [#allocation3], 0  ;;  %s352_s0 = inlined_call_operand.hbm [shape: f32[8,16], index: 0, kind: input, shape index: {}]   ;;  %s353_s1 = inlined_call_operand.hbm [shape: f32[16,128], index: 1, kind: input, shape index: {}]   ;;  %s354_s2 = inlined_call_operand.vmem [shape: f32[1,128], index: 2, kind: input, shape index: {}]   ;;  %s355_s3 = inlined_call_operand.hbm [shape: f32[128,128], index: 3, kind: input, shape index: {}]   ;;  %s356_s4 = inlined_call_operand.vmem [shape: f32[1,128], index: 4, kind: input, shape index: {}]   ;;  %s357_s5 = inlined_call_operand.hbm [shape: f32[8,128], index: 5, kind: output, shape index: {}]  }
   0x1   :  { %11 = vsyncpa [#allocation6], 0  ;;  %s28_s20 = sshll.u32 %s353_s1, 4  ;;  %s29_s20 = int_to_ptr.hbm [resolvable:$true] %s28_s20 }
   0x2   :  { %12 = vsyncpa [#allocation4], 0  ;;  %s298_s21 = smov [#allocation5]   ;;  %s18_s25 = sshll.u32 %s352_s0, 4  ;;  %s19_s25 = int_to_ptr.hbm [resolvable:$true] %s18_s25 }
   0x3   :  { %s30_s22 = sshll.u32 %s298_s21, 4  ;;  %s299_s26 = smov 128   ;;  %s31_s22 = int_to_ptr.vmem [resolvable:$true] %s30_s22 }
   0x4   :  { %s300_s27 = smov 8   ;;  %s301_s28 = smov [#allocation2]  }
   0x5   :  { %36 = dma.hbm_to_vmem [thread:$0]  %s29_s20, 256, %s31_s22, [#allocation6], %s299_s26, %s299_s26, %s300_s27  }
   0x6   :  { %s20_s29 = sshll.u32 %s301_s28, 4  ;;  %s43_s7 = sshll.u32 %s355_s3, 4  ;;  %s21_s29 = int_to_ptr.vmem [resolvable:$true] %s20_s29  ;;  %s44_s7 = int_to_ptr.hbm [resolvable:$true] %s43_s7 }
   0x7   :  { %23 = dma.hbm_to_vmem [thread:$0]  %s19_s25, 128, %s21_s29, [#allocation3]  }
   0x8   :  { %s302_s1 = smov [#allocation7]  }
   0x9   :  { %s45_s8 = sshll.u32 %s302_s1, 4  ;;  %s46_s8 = int_to_ptr.vmem [resolvable:$true] %s45_s8 }
   0xa   :  { %51 = dma.hbm_to_vmem [thread:$0]  %s44_s7, 2048, %s46_s8, [#allocation6], %s299_s26, %s299_s26, %s300_s27  }
   0xb   :  { %292 = dma.done.wait [#allocation3], 128  }
   0xc   :  { %293 = vsyncadd [#allocation3], 4294967168 }
   0xd   :  { %294 = dma.done.wait [#allocation6], 2304  }
   0xe   :  { %295 = vsyncadd [#allocation6], 4294964992  ;;  %v68_v0 = vld [vmem:[#allocation5 + $0x8] sm:$0xff]  ;;  %v67_v1 = vld [vmem:[#allocation5] sm:$0xff]  ;;  %vm73_vm0 = vcmask 130048   ;;  %v138_v23 = vlaneseq  ;;  %s172_s13 = sshll.u32 %s357_s5, 4  ;;  %s173_s13 = int_to_ptr.hbm [resolvable:$true] %s172_s13 }
   0xf   :  { %91 = vmatpush.msra.mxu0 %v68_v0  ;;  %v66_v2 = vld [vmem:[#allocation2] sm:$0xff]  ;;  %v113_v3 = vld [vmem:[#allocation7 + $0x78] sm:$0xff]  ;;  %v112_v4 = vld [vmem:[#allocation7 + $0x70] sm:$0xff] }
  0x10   :  { %118 = vmatpush.msra.mxu1 %v113_v3  ;;  %v111_v5 = vld [vmem:[#allocation7 + $0x68] sm:$0xff]  ;;  %v110_v6 = vld [vmem:[#allocation7 + $0x60] sm:$0xff]  ;;  %v109_v7 = vld [vmem:[#allocation7 + $0x58] sm:$0xff]  ;;  %v139_v24 = vand.u32 127, %v138_v23 }
  0x11   :  { %92 = vmatpush.msra.mxu0 %v67_v1  ;;  %v108_v8 = vld [vmem:[#allocation7 + $0x50] sm:$0xff]  ;;  %v107_v9 = vld [vmem:[#allocation7 + $0x48] sm:$0xff]  ;;  %v106_v10 = vld [vmem:[#allocation7 + $0x40] sm:$0xff] }
  0x12   :  { %183 = vmatmul.msk.f32.vlgmr.msra.gmra.mxu0 %vm73_vm0, %v66_v2  ;;  %119 = vmatpush.msra.mxu1 %v112_v4  ;;  %v105_v11 = vld [vmem:[#allocation7 + $0x38] sm:$0xff]  ;;  %v104_v12 = vld [vmem:[#allocation7 + $0x30] sm:$0xff]  ;;  %v103_v13 = vld [vmem:[#allocation7 + $0x28] sm:$0xff]  ;;  %vm140_vm1 = vcmp.lt.s32.totalorder %v139_v24, 3 }
  0x13   :  { %v102_v14 = vld [vmem:[#allocation7 + $0x20] sm:$0xff]  ;;  %v101_v15 = vld [vmem:[#allocation7 + $0x18] sm:$0xff]  ;;  %v100_v16 = vld [vmem:[#allocation7 + $0x10] sm:$0xff] }
  0x14   :  { %120 = vmatpush.msra.mxu1 %v111_v5  ;;  %v99_v17 = vld [vmem:[#allocation7 + $0x8] sm:$0xff]  ;;  %v98_v18 = vld [vmem:[#allocation7] sm:$0xff] }
  0x15   :  { %v190_v19 = vld [vmem:[%s354_s2] ss:$0 sm:$0xff]  ;;  %s303_s2 = smov [#allocation8]  }
  0x16   :  { %121 = vmatpush.msra.mxu1 %v110_v6  ;;  %v191_v25 = vld [vmem:[%s356_s4] ss:$0 sm:$0xff]  ;;  %s170_s4 = sshll.u32 %s303_s2, 4  ;;  %s171_s4 = int_to_ptr.vmem [resolvable:$true] %s170_s4 }
  0x18   :  { %122 = vmatpush.msra.mxu1 %v109_v7 }
  0x1a   :  { %123 = vmatpush.msra.mxu1 %v108_v8 }
  0x1c   :  { %124 = vmatpush.msra.mxu1 %v107_v9 }
  0x1e   :  { %125 = vmatpush.msra.mxu1 %v106_v10 }
  0x20   :  { %126 = vmatpush.msra.mxu1 %v105_v11 }
  0x22   :  { %127 = vmatpush.msra.mxu1 %v104_v12 }
  0x24   :  { %128 = vmatpush.msra.mxu1 %v103_v13 }
  0x26   :  { %129 = vmatpush.msra.mxu1 %v102_v14 }
  0x28   :  { %130 = vmatpush.msra.mxu1 %v101_v15 }
  0x2a   :  { %131 = vmatpush.msra.mxu1 %v100_v16 }
  0x2c   :  { %132 = vmatpush.msra.mxu1 %v99_v17 }
  0x2e   :  { %133 = vmatpush.msra.mxu1 %v98_v18 }
  0x8f   :  { %v94_v20 = vpop.f32.mrf.mxu0 }
  0x90   :  { %v95_v21 = vadd.f32 %v190_v19, %v94_v20 }
  0x92   :  { %v97_v22 = vmax.f32 %v95_v21, 0.0 }
  0x94   :  { %134 = vmatmul.f32.vlgmr.msra.gmra.mxu1 %v97_v22 }
 0x111   :  { %v135_v26 = vpop.f32.mrf.mxu1 }
 0x112   :  { %v136_v27 = vadd.f32 %v191_v25, %v135_v26 }
 0x114   :  { %v141_v28 = vsel %vm140_vm1, %v136_v27, -1e+30 }
 0x115   :  { %142 = vmax.xlane.f32.xlu0 %v141_v28 }
 0x188   :  { %v143_v29 = vpop.xlane.xlu0 %142 }
 0x189   :  { %v144_v30 = vsub.f32 %v141_v28, %v143_v29 }
 0x18b   :  { %v145_v31 = vmul.f32 1.442695, %v144_v30 }
 0x18d   :  { %192 = vpow2.f32 %v145_v31 }
 0x193   :  { %v193_v32 = vpop.eup %192 }
 0x194   :  { %147 = vadd.xlane.f32.xlu0 %v193_v32 }
 0x207   :  { %v148_v33 = vpop.xlane.xlu0 %147 }
 0x208   :  { %194 = vrcp.f32 %v148_v33  ;;  %v160_v37 = vand.u32 2147483648, %v148_v33  ;;  %v158_v39 = vand.u32 2147483647, %v148_v33  ;;  %vm154_vm3 = vweird.f32 %v148_v33 }
 0x20a   :  { %v161_v41 = vor.u32 1.1754944e-38, %v160_v37  ;;  %vm159_vm5 = vcmp.eq.f32.partialorder %v158_v39, 8.507059e+37 }
 0x20e   :  { %v195_v34 = vpop.eup %194 }
 0x20f   :  { %v150_v35 = vmul.f32 %v195_v34, %v148_v33  ;;  %vm155_vm2 = vweird.f32 %v195_v34 }
 0x210   :  { %vm156_vm4 = vmor %vm154_vm3, %vm155_vm2 }
 0x211   :  { %v151_v36 = vsub.f32 1.0, %v150_v35 }
 0x213   :  { %v152_v38 = vmul.f32 %v195_v34, %v151_v36 }
 0x215   :  { %v153_v40 = vadd.f32 %v195_v34, %v152_v38 }
 0x217   :  { %v157_v42 = vsel %vm156_vm4, %v195_v34, %v153_v40 }
 0x218   :  { %v162_v43 = vsel %vm159_vm5, %v161_v41, %v157_v42 }
 0x219   :  { %v163_v44 = vmul.f32 %v193_v32, %v162_v43 }
 0x21b   :  { %164 = vst [vmem:[#allocation8] sm:$0xff] %v163_v44 }
 0x21c   :  { %175 = dma.vmem_to_hbm [thread:$0]  %s171_s4, 128, %s173_s13, [#allocation4]  }
 0x21d   :  { %296 = dma.done.wait [#allocation4], 128  }
 0x21e   :  { %297 = vsyncadd [#allocation4], 4294967168 }
 0x21f   :  { %180 = vsyncpa [#allocation3], 1 }
 0x220   :  { %181 = vsyncpa [#allocation6], 1 }
 0x221   :  { %182 = vsyncpa [#allocation4], 1 }

</bundles_post_ra>
